<compile_context>
chip_gen: v6e
topology: v6e:2x2x1
jax: 0.10.0
libtpu: 0.0.40
codegen_flags: <defaults>
</compile_context>

<pallas_src>
from functools import partial

import jax
import jax.numpy as jnp
from jax.experimental import pallas as pl
from jax.experimental.pallas import tpu as pltpu


def _policy_kernel(x_ref, w1_ref, b1_ref, w2_ref, b2_ref, w3_ref, b3_ref, o_ref):
    # One batch tile per grid step; weights/biases stay VMEM-resident (single-buffered).
    # Matmuls feed the MXU in bf16 with f32 accumulation; bias + ReLU run in f32.
    x = x_ref[...].astype(jnp.bfloat16)                               # in-kernel cast
    h1 = jnp.dot(x, w1_ref[...], preferred_element_type=jnp.float32)
    h1 = jnp.maximum(h1 + b1_ref[...], 0.0)
    h2 = jnp.dot(h1.astype(jnp.bfloat16), w2_ref[...],
                 preferred_element_type=jnp.float32)
    h2 = jnp.maximum(h2 + b2_ref[...], 0.0)
    logits = jnp.dot(h2.astype(jnp.bfloat16), w3_ref[...],
                     preferred_element_type=jnp.float32) + b3_ref[...]
    o_ref[...] = logits.astype(o_ref.dtype)                           # lane-dense (TB, Ap)


def _round_up(n, m):
    return ((n + m - 1) // m) * m


def _vmem_capacity_bytes():
    try:
        return int(pltpu.get_tpu_info().vmem_capacity_bytes)
    except Exception:
        return 64 * 1024 * 1024  # conservative (v7x per-TC)


def _vmem_need_bytes(tb, d, hbp, hp, ap, x_bytes, out_bytes):
    bf16, f32 = 2, 4
    stream = 2 * tb * d * x_bytes + 2 * tb * ap * out_bytes           # double-buffered x / out
    resident = (d * hbp + hbp * hp + hp * ap) * bf16 + (hbp + hp + ap) * f32   # Buffered(1)
    temps = tb * d * bf16 + tb * (hbp + hp) * (f32 + bf16) + tb * ap * f32
    return stream + resident + temps


def _resident_spec(shape):
    # Constant index_map => block never re-fetched; single-buffer it to halve its VMEM.
    try:
        return pl.BlockSpec(shape, lambda i: (0, 0), pipeline_mode=pl.Buffered(1))
    except TypeError:  # older BlockSpec without pipeline_mode
        return pl.BlockSpec(shape, lambda i: (0, 0))


@partial(jax.jit, static_argnames=("out_dtype",))
def shared_backbone_forward(x, params, out_dtype=jnp.float32):
    """Pallas implementation of SharedBackboneNet.forward(x) -> policy logits [B, act_dim]."""
    w1, b1, w2, b2, w3, b3 = params                                    # f32, [in, out] layout
    B, D = x.shape
    Hb, H, A = w1.shape[1], w2.shape[1], w3.shape[1]

    # Feature dims of the weights padded to the 128-lane granule (zero padding is exact
    # through Linear + ReLU).  x keeps its true feature width D (full-dim block is legal).
    # TODO(synk): for multi-K wide MLPs, pad K/N to 256 to fill the v6e/v7x 256x256 MXU.
    Hbp, Hp, Ap = (_round_up(d, 128) for d in (Hb, H, A))
    x_bytes = jnp.dtype(x.dtype).itemsize
    out_bytes = jnp.dtype(out_dtype).itemsize

    # Batch tile from the generation-aware VMEM budget; keep it a multiple of 16.
    vmem_budget = int(0.55 * _vmem_capacity_bytes())
    TB = min(1024, _round_up(B, 16))
    while TB > 16 and _vmem_need_bytes(TB, D, Hbp, Hp, Ap, x_bytes, out_bytes) > vmem_budget:
        TB = max(16, ((TB // 2) // 16) * 16)
    if B >= 256 and TB >= B:
        TB = max(16, _round_up((B + 1) // 2, 16))   # >=2 grid steps -> both TCs on v7x
    if TB >= B:
        TB, Bp = B, B                               # single full block, no batch padding
    else:
        Bp = _round_up(B, TB)

    # Streamed input: unpadded feature dim, batch padded only if the tile requires it.
    x_in = x if Bp == B else jnp.pad(x, ((0, Bp - B), (0, 0)))

    # Resident weights/biases: bf16 weights, f32 biases, lane-padded.  (For repeated
    # calls these could be pre-padded once and cached; under jit the pads are cheap.)
    bf = jnp.bfloat16
    w1p = jnp.pad(w1.astype(bf), ((0, 0), (0, Hbp - Hb)))
    w2p = jnp.pad(w2.astype(bf), ((0, Hbp - Hb), (0, Hp - H)))
    w3p = jnp.pad(w3.astype(bf), ((0, Hp - H), (0, Ap - A)))
    b1p = jnp.pad(b1.astype(jnp.float32), ((0, 0), (0, Hbp - Hb)))
    b2p = jnp.pad(b2.astype(jnp.float32), ((0, 0), (0, Hp - H)))
    b3p = jnp.pad(b3.astype(jnp.float32), ((0, 0), (0, Ap - A)))

    needed = _vmem_need_bytes(TB, D, Hbp, Hp, Ap, x_bytes, out_bytes)
    cp = {"dimension_semantics": ("parallel",)}                        # shard batch over TCs
    if needed > 12 * 1024 * 1024:                                      # v5e default scoped = 16 MiB
        cp["vmem_limit_bytes"] = min(max(needed * 5 // 4, 16 * 1024 * 1024),
                                     int(0.75 * _vmem_capacity_bytes()))

    flops = 2 * Bp * (D * Hbp + Hbp * Hp + Hp * Ap)
    bytes_accessed = (x_in.size * x_bytes
                      + (w1p.size + w2p.size + w3p.size) * 2
                      + (b1p.size + b2p.size + b3p.size) * 4
                      + Bp * Ap * out_bytes)

    out = pl.pallas_call(
        _policy_kernel,
        out_shape=jax.ShapeDtypeStruct((Bp, Ap), out_dtype),
        grid=(Bp // TB,),
        in_specs=[
            pl.BlockSpec((TB, D), lambda i: (i, 0)),                   # streamed, pipelined
            _resident_spec((D, Hbp)), _resident_spec((1, Hbp)),
            _resident_spec((Hbp, Hp)), _resident_spec((1, Hp)),
            _resident_spec((Hp, Ap)), _resident_spec((1, Ap)),
        ],
        out_specs=pl.BlockSpec((TB, Ap), lambda i: (i, 0)),            # lane-dense output
        compiler_params=pltpu.CompilerParams(**cp),
        cost_estimate=pl.CostEstimate(flops=flops, transcendentals=0,
                                      bytes_accessed=bytes_accessed),
    )(x_in, w1p, b1p, w2p, b2p, w3p, b3p)

    return out[:B, :A]


def init_params(key, obs_dim, act_dim, hidden_dim=64, backbone_dim=None):
    """PyTorch-Linear-style init (uniform +-1/sqrt(fan_in)), [in, out] layout."""
    if backbone_dim is None:
        backbone_dim = hidden_dim
    ks = jax.random.split(key, 6)

    def lin(kw, kb, fan_in, fan_out):
        bound = 1.0 / jnp.sqrt(jnp.float32(fan_in))
        w = jax.random.uniform(kw, (fan_in, fan_out), jnp.float32, -bound, bound)
        b = jax.random.uniform(kb, (1, fan_out), jnp.float32, -bound, bound)
        return w, b

    w1, b1 = lin(ks[0], ks[1], obs_dim, backbone_dim)        # backbone
    w2, b2 = lin(ks[2], ks[3], backbone_dim, hidden_dim)     # policy-head hidden
    w3, b3 = lin(ks[4], ks[5], hidden_dim, act_dim)          # policy-head output
    return (w1, b1, w2, b2, w3, b3)


def _reference(x, params):
    w1, b1, w2, b2, w3, b3 = params
    h1 = jnp.maximum(x @ w1 + b1, 0.0)
    h2 = jnp.maximum(h1 @ w2 + b2, 0.0)
    return h2 @ w3 + b3


if __name__ == "__main__":
    B, OBS, ACT, HID = 8, 32, 4, 64
    key = jax.random.PRNGKey(0)
    kx, kp = jax.random.split(key)
    x = jax.random.normal(kx, (B, OBS), jnp.float32)
    params = init_params(kp, OBS, ACT, HID)

    out = jax.block_until_ready(shared_backbone_forward(x, params))
    ref = _reference(x, params)

    assert out.shape == (B, ACT)
    # bf16 MXU inputs with f32 accumulation -> loosened tolerance vs f32 reference.
    assert jnp.allclose(out, ref, atol=5e-2, rtol=5e-2)
    print("KERNEL_OK")
</pallas_src>

<mosaic_0001>
module attributes {stable_mosaic.version = 11 : i64} {
  func.func @_policy_kernel(%arg0: i32, %arg1: memref<8x32xf32, #tpu.memory_space<vmem>>, %arg2: memref<32x128xbf16, #tpu.memory_space<vmem>>, %arg3: memref<1x128xf32, #tpu.memory_space<vmem>>, %arg4: memref<128x128xbf16, #tpu.memory_space<vmem>>, %arg5: memref<1x128xf32, #tpu.memory_space<vmem>>, %arg6: memref<128x128xbf16, #tpu.memory_space<vmem>>, %arg7: memref<1x128xf32, #tpu.memory_space<vmem>>, %arg8: memref<8x128xf32, #tpu.memory_space<vmem>>) attributes {dimension_semantics = [#tpu.dimension_semantics<parallel>], iteration_bounds = array<i64: 1>, scalar_prefetch = 0 : i64, scratch_operands = 0 : i64, tpu.core_type = #tpu.core_type<tc>, window_params = [{transform_indices = @transform_0, window_bounds = array<i64: 8, 32>}, {pipeline_mode = #tpu.pipeline_mode<synchronous>, transform_indices = @transform_1, window_bounds = array<i64: 32, 128>}, {pipeline_mode = #tpu.pipeline_mode<synchronous>, transform_indices = @transform_2, window_bounds = array<i64: 1, 128>}, {pipeline_mode = #tpu.pipeline_mode<synchronous>, transform_indices = @transform_3, window_bounds = array<i64: 128, 128>}, {pipeline_mode = #tpu.pipeline_mode<synchronous>, transform_indices = @transform_4, window_bounds = array<i64: 1, 128>}, {pipeline_mode = #tpu.pipeline_mode<synchronous>, transform_indices = @transform_5, window_bounds = array<i64: 128, 128>}, {pipeline_mode = #tpu.pipeline_mode<synchronous>, transform_indices = @transform_6, window_bounds = array<i64: 1, 128>}, {transform_indices = @transform_7, window_bounds = array<i64: 8, 128>}]} {
    %c0 = arith.constant 0 : index
    %c0_0 = arith.constant 0 : index
    %0 = vector.load %arg1[%c0, %c0_0] : memref<8x32xf32, #tpu.memory_space<vmem>>, vector<8x32xf32>
    %1 = arith.truncf %0 : vector<8x32xf32> to vector<8x32xbf16>
    %c0_1 = arith.constant 0 : index
    %c0_2 = arith.constant 0 : index
    %2 = vector.load %arg2[%c0_1, %c0_2] : memref<32x128xbf16, #tpu.memory_space<vmem>>, vector<32x128xbf16>
    %cst = arith.constant dense<0.000000e+00> : vector<8x128xf32>
    %3 = tpu.matmul %1, %2, %cst {dimension_numbers = #tpu.dot_dimension_numbers<[1], [0], [0], [1], [0, 0, 1, 1], [], []>} : vector<8x32xbf16>, vector<32x128xbf16>, vector<8x128xf32> -> vector<8x128xf32>
    %c0_3 = arith.constant 0 : index
    %c0_4 = arith.constant 0 : index
    %4 = vector.load %arg3[%c0_3, %c0_4] : memref<1x128xf32, #tpu.memory_space<vmem>>, vector<1x128xf32>
    %5 = vector.broadcast %4 : vector<1x128xf32> to vector<8x128xf32>
    %6 = arith.addf %3, %5 : vector<8x128xf32>
    %cst_5 = arith.constant 0.000000e+00 : f32
    %7 = vector.broadcast %cst_5 : f32 to vector<8x128xf32>
    %8 = arith.maximumf %6, %7 : vector<8x128xf32>
    %9 = arith.truncf %8 : vector<8x128xf32> to vector<8x128xbf16>
    %c0_6 = arith.constant 0 : index
    %c0_7 = arith.constant 0 : index
    %10 = vector.load %arg4[%c0_6, %c0_7] : memref<128x128xbf16, #tpu.memory_space<vmem>>, vector<128x128xbf16>
    %cst_8 = arith.constant dense<0.000000e+00> : vector<8x128xf32>
    %11 = tpu.matmul %9, %10, %cst_8 {dimension_numbers = #tpu.dot_dimension_numbers<[1], [0], [0], [1], [0, 0, 1, 1], [], []>} : vector<8x128xbf16>, vector<128x128xbf16>, vector<8x128xf32> -> vector<8x128xf32>
    %c0_9 = arith.constant 0 : index
    %c0_10 = arith.constant 0 : index
    %12 = vector.load %arg5[%c0_9, %c0_10] : memref<1x128xf32, #tpu.memory_space<vmem>>, vector<1x128xf32>
    %13 = vector.broadcast %12 : vector<1x128xf32> to vector<8x128xf32>
    %14 = arith.addf %11, %13 : vector<8x128xf32>
    %cst_11 = arith.constant 0.000000e+00 : f32
    %15 = vector.broadcast %cst_11 : f32 to vector<8x128xf32>
    %16 = arith.maximumf %14, %15 : vector<8x128xf32>
    %17 = arith.truncf %16 : vector<8x128xf32> to vector<8x128xbf16>
    %c0_12 = arith.constant 0 : index
    %c0_13 = arith.constant 0 : index
    %18 = vector.load %arg6[%c0_12, %c0_13] : memref<128x128xbf16, #tpu.memory_space<vmem>>, vector<128x128xbf16>
    %cst_14 = arith.constant dense<0.000000e+00> : vector<8x128xf32>
    %19 = tpu.matmul %17, %18, %cst_14 {dimension_numbers = #tpu.dot_dimension_numbers<[1], [0], [0], [1], [0, 0, 1, 1], [], []>} : vector<8x128xbf16>, vector<128x128xbf16>, vector<8x128xf32> -> vector<8x128xf32>
    %c0_15 = arith.constant 0 : index
    %c0_16 = arith.constant 0 : index
    %20 = vector.load %arg7[%c0_15, %c0_16] : memref<1x128xf32, #tpu.memory_space<vmem>>, vector<1x128xf32>
    %21 = vector.broadcast %20 : vector<1x128xf32> to vector<8x128xf32>
    %22 = arith.addf %19, %21 : vector<8x128xf32>
    %c0_17 = arith.constant 0 : index
    %c0_18 = arith.constant 0 : index
    %23 = vector.load %arg8[%c0_17, %c0_18] : memref<8x128xf32, #tpu.memory_space<vmem>>, vector<8x128xf32>
    tpu.vector_store %arg8[%c0_17, %c0_18], %22 {strides = array<i32>} : memref<8x128xf32, #tpu.memory_space<vmem>>, vector<8x128xf32>,
    return
  }
  func.func @transform_0(%arg0: i32) -> (i32, i32) {
    %c0_i32 = arith.constant 0 : i32
    %c0_i32_0 = arith.constant 0 : i32
    return %arg0, %c0_i32 : i32, i32
  }
  func.func @transform_1(%arg0: i32) -> (i32, i32) {
    %c0_i32 = arith.constant 0 : i32
    %c0_i32_0 = arith.constant 0 : i32
    %c0_i32_1 = arith.constant 0 : i32
    return %c0_i32, %c0_i32_0 : i32, i32
  }
  func.func @transform_2(%arg0: i32) -> (i32, i32) {
    %c0_i32 = arith.constant 0 : i32
    %c0_i32_0 = arith.constant 0 : i32
    %c0_i32_1 = arith.constant 0 : i32
    return %c0_i32, %c0_i32_0 : i32, i32
  }
  func.func @transform_3(%arg0: i32) -> (i32, i32) {
    %c0_i32 = arith.constant 0 : i32
    %c0_i32_0 = arith.constant 0 : i32
    %c0_i32_1 = arith.constant 0 : i32
    return %c0_i32, %c0_i32_0 : i32, i32
  }
  func.func @transform_4(%arg0: i32) -> (i32, i32) {
    %c0_i32 = arith.constant 0 : i32
    %c0_i32_0 = arith.constant 0 : i32
    %c0_i32_1 = arith.constant 0 : i32
    return %c0_i32, %c0_i32_0 : i32, i32
  }
  func.func @transform_5(%arg0: i32) -> (i32, i32) {
    %c0_i32 = arith.constant 0 : i32
    %c0_i32_0 = arith.constant 0 : i32
    %c0_i32_1 = arith.constant 0 : i32
    return %c0_i32, %c0_i32_0 : i32, i32
  }
  func.func @transform_6(%arg0: i32) -> (i32, i32) {
    %c0_i32 = arith.constant 0 : i32
    %c0_i32_0 = arith.constant 0 : i32
    %c0_i32_1 = arith.constant 0 : i32
    return %c0_i32, %c0_i32_0 : i32, i32
  }
  func.func @transform_7(%arg0: i32) -> (i32, i32) {
    %c0_i32 = arith.constant 0 : i32
    %c0_i32_0 = arith.constant 0 : i32
    return %arg0, %c0_i32 : i32, i32
  }
}

</mosaic_0001>

<bundles_post_ra>
// kernel: shared_backbone_forward.1
= control target key start
LH: loop header
LB: loop body
LE: loop exit
PB: predicated region body
PF: predicated region fallthrough
CT: control target
= control target key end

     0   :  { %v438_v0 = vmov 0.0   ;;  %vm439_vm0 = vmmov 0   ;;  %vm52_vm1 = vcmask 261120   ;;  %s573_s1 = inlined_call_operand.vmem [shape: bf16[32,128], index: 1, kind: input, shape index: {}]   ;;  %s574_s0 = inlined_call_operand.vmem [shape: f32[8,32], index: 0, kind: input, shape index: {}]   ;;  %s575_s3 = inlined_call_operand.vmem [shape: bf16[128,128], index: 3, kind: input, shape index: {}]   ;;  %s576_s5 = inlined_call_operand.vmem [shape: bf16[128,128], index: 5, kind: input, shape index: {}]   ;;  %s577_s2 = inlined_call_operand.vmem [shape: f32[1,128], index: 2, kind: input, shape index: {}]   ;;  %s578_s4 = inlined_call_operand.vmem [shape: f32[1,128], index: 4, kind: input, shape index: {}]   ;;  %s579_s6 = inlined_call_operand.vmem [shape: f32[1,128], index: 6, kind: input, shape index: {}]   ;;  %s580_s7 = inlined_call_operand.vmem [shape: f32[8,128], index: 7, kind: output, shape index: {}]  }
   0x1   :  { %370 = vmatprep.subr.bf16.mxu0 %v438_v0  ;;  %v420_v1 = vld [vmem:[%s573_s1 + $0x8] sm:$0xff]   ;;  %374 = vmatprep.mubr.msk.bf16.mxu0 %vm439_vm0, %v438_v0  ;;  %v421_v2 = vld [vmem:[%s573_s1] sm:$0xff]   ;;  %v422_v4 = vld [vmem:[%s575_s3 + $0x38] sm:$0xff]  }
   0x2   :  { %378 = vmatprep.subr.bf16.mxu1 %v438_v0  ;;  %394 = vmatprep.mubr.msk.bf16.mxu1 %vm439_vm0, %v438_v0  ;;  %v27_v3 = vld [vmem:[%s574_s0] sm:$0xff]  ;;  %v423_v6 = vld [vmem:[%s575_s3 + $0x30] sm:$0xff]   ;;  %v424_v7 = vld [vmem:[%s575_s3 + $0x28] sm:$0xff]  }
   0x3   :  { %371 = vmatpush3.bf16.msra.mxu0 %v420_v1  ;;  %v28_v5 = vpack.c.bf16 %v27_v3, %v27_v3  ;;  %379 = vmatpush3.bf16.msra.mxu1 %v422_v4  ;;  %v425_v8 = vld [vmem:[%s575_s3 + $0x20] sm:$0xff]   ;;  %v426_v9 = vld [vmem:[%s575_s3 + $0x18] sm:$0xff]   ;;  %v427_v10 = vld [vmem:[%s575_s3 + $0x10] sm:$0xff]  }
   0x4   :  { %372 = vmatprep.subr.bf16.mxu0 %v438_v0  ;;  %380 = vmatprep.subr.bf16.mxu1 %v438_v0  ;;  %v428_v11 = vld [vmem:[%s575_s3 + $0x8] sm:$0xff]   ;;  %v429_v12 = vld [vmem:[%s575_s3] sm:$0xff]   ;;  %v430_v13 = vld [vmem:[%s576_s5 + $0x38] sm:$0xff]  }
   0x5   :  { %v431_v14 = vld [vmem:[%s576_s5 + $0x30] sm:$0xff]   ;;  %v432_v15 = vld [vmem:[%s576_s5 + $0x28] sm:$0xff]   ;;  %v433_v16 = vld [vmem:[%s576_s5 + $0x20] sm:$0xff]  }
   0x6   :  { %v434_v17 = vld [vmem:[%s576_s5 + $0x18] sm:$0xff]   ;;  %v435_v18 = vld [vmem:[%s576_s5 + $0x10] sm:$0xff]   ;;  %v327_v19 = vld [vmem:[%s577_s2] ss:$0 sm:$0xff] }
   0x7   :  { %373 = vmatpush3.bf16.msra.mxu0 %v421_v2  ;;  %381 = vmatpush3.bf16.msra.mxu1 %v423_v6  ;;  %v436_v27 = vld [vmem:[%s576_s5 + $0x8] sm:$0xff]   ;;  %v437_v28 = vld [vmem:[%s576_s5] sm:$0xff]  }
   0x8   :  { %398 = vmatprep.subr.bf16.mxu0 %v438_v0  ;;  %382 = vmatprep.subr.bf16.mxu1 %v438_v0  ;;  %v331_v29 = vld [vmem:[%s578_s4] ss:$0 sm:$0xff] }
   0x9   :  { %v340_v37 = vld [vmem:[%s579_s6] ss:$0 sm:$0xff] }
   0xa   :  { %375 = vmatmul.mubr.msk.bf16.vlgmr.msra.gmra.mxu0 %vm52_vm1, %v28_v5 }
   0xb   :  { %414 = vmatprep.mubr.msk.bf16.mxu0 %vm439_vm0, %v438_v0  ;;  %383 = vmatpush3.bf16.msra.mxu1 %v424_v7 }
   0xc   :  { %384 = vmatprep.subr.bf16.mxu1 %v438_v0  ;;  %399 = vmatpush3.bf16.msra.mxu0 %v430_v13 }
   0xd   :  { %400 = vmatprep.subr.bf16.mxu0 %v438_v0 }
   0xf   :  { %385 = vmatpush3.bf16.msra.mxu1 %v425_v8 }
  0x10   :  { %386 = vmatprep.subr.bf16.mxu1 %v438_v0  ;;  %401 = vmatpush3.bf16.msra.mxu0 %v431_v14 }
  0x11   :  { %402 = vmatprep.subr.bf16.mxu0 %v438_v0 }
  0x13   :  { %387 = vmatpush3.bf16.msra.mxu1 %v426_v9 }
  0x14   :  { %388 = vmatprep.subr.bf16.mxu1 %v438_v0  ;;  %403 = vmatpush3.bf16.msra.mxu0 %v432_v15 }
  0x15   :  { %404 = vmatprep.subr.bf16.mxu0 %v438_v0 }
  0x17   :  { %389 = vmatpush3.bf16.msra.mxu1 %v427_v10 }
  0x18   :  { %390 = vmatprep.subr.bf16.mxu1 %v438_v0  ;;  %405 = vmatpush3.bf16.msra.mxu0 %v433_v16 }
  0x19   :  { %406 = vmatprep.subr.bf16.mxu0 %v438_v0 }
  0x1b   :  { %391 = vmatpush3.bf16.msra.mxu1 %v428_v11 }
  0x1c   :  { %392 = vmatprep.subr.bf16.mxu1 %v438_v0  ;;  %407 = vmatpush3.bf16.msra.mxu0 %v434_v17 }
  0x1d   :  { %408 = vmatprep.subr.bf16.mxu0 %v438_v0 }
  0x1f   :  { %393 = vmatpush3.bf16.msra.mxu1 %v429_v12 }
  0x20   :  { %409 = vmatpush3.bf16.msra.mxu0 %v435_v18 }
  0x21   :  { %410 = vmatprep.subr.bf16.mxu0 %v438_v0 }
  0x24   :  { %411 = vmatpush3.bf16.msra.mxu0 %v436_v27 }
  0x25   :  { %412 = vmatprep.subr.bf16.mxu0 %v438_v0 }
  0x28   :  { %413 = vmatpush3.bf16.msra.mxu0 %v437_v28 }
  0xca   :  { %v90_v20 = vpop.f32.mrf.mxu0 }
  0xcb   :  { %v91_v21 = vadd.f32 %v327_v19, %v90_v20 }
  0xcc   :  { %v376_v22 = vpop.f32.mrf.mxu0 }
  0xcd   :  { %v96_v23 = vmax.f32 %v91_v21, 0.0 }
  0xce   :  { %v93_v24 = vpop.f32.mrf.mxu0 }
  0xcf   :  { %v97_v25 = vpack.c.bf16 %v96_v23, %v96_v23 }
  0xd0   :  { %v377_v26 = vpop.f32.mrf.mxu0 }
  0xd1   :  { %395 = vmatmul.mubr.bf16.vlgmr.msra.gmra.mxu1 %v97_v25 }
 0x191   :  { %v203_v30 = vpop.f32.mrf.mxu1 }
 0x192   :  { %v204_v31 = vadd.f32 %v331_v29, %v203_v30 }
 0x193   :  { %v396_v32 = vpop.f32.mrf.mxu1 }
 0x194   :  { %v209_v33 = vmax.f32 %v204_v31, 0.0 }
 0x195   :  { %v206_v34 = vpop.f32.mrf.mxu1 }
 0x196   :  { %v210_v35 = vpack.c.bf16 %v209_v33, %v209_v33 }
 0x197   :  { %v397_v36 = vpop.f32.mrf.mxu1 }
 0x198   :  { %415 = vmatmul.mubr.bf16.vlgmr.msra.gmra.mxu0 %v210_v35 }
 0x258   :  { %v316_v38 = vpop.f32.mrf.mxu0 }
 0x259   :  { %v317_v39 = vadd.f32 %v340_v37, %v316_v38 }
 0x25a   :  { %v416_v40 = vpop.f32.mrf.mxu0 }
 0x25b   :  { %322 = vst [vmem:[%s580_s7] sm:$0xff] %v317_v39 }
 0x25c   :  { %v319_v41 = vpop.f32.mrf.mxu0 }
 0x25e   :  { %v417_v42 = vpop.f32.mrf.mxu0 }

</bundles_post_ra>
